<compile_context>
chip_gen: v5e
topology: v5e:2x2
jax: 0.10.0
libtpu: 0.0.40
codegen_flags: <defaults>
</compile_context>

<pallas_src>
import jax
import jax.numpy as jnp
from jax.experimental import pallas as pl
from jax.experimental.pallas import tpu as pltpu

LANE = 128     # vreg lane width
SUBLANE = 8    # vreg sublane count (f32)


def _round_up(x, m):
    return (x + m - 1) // m * m


# --------------------------------------------------------------------------
# Kernel
# --------------------------------------------------------------------------
def word_lstm_cell_kernel(x_ref, h_ref, c0_ref, wih_ref, whh_ref, b_ref, c1_ref):
    """Two accumulating gate matmuls + LSTM-cell elementwise combine.

    x_ref   : [tb, D_in]        input slice                     (f32, cast in-kernel)
    h_ref   : [tb, H]           h_0 slice                       (f32, cast in-kernel)
    c0_ref  : [tb, h_pad]       c_0, lane-padded layout         (f32)
    wih_ref : [D_in, 3*h_pad]   W_ih, per-gate zero-padded cols (matmul dtype, resident)
    whh_ref : [H,    3*h_pad]   W_hh, per-gate zero-padded cols (matmul dtype, resident)
    b_ref   : [1,    3*h_pad]   bias, per-gate zero-padded      (f32, resident)
    c1_ref  : [tb, h_pad]       c_1 output (padded lanes stay exactly 0)
    """
    mm_dtype = wih_ref.dtype
    h_pad = c1_ref.shape[1]

    # Two MXU contractions with f32 accumulation (same total K as the fused
    # [x|h] formulation, without materializing the concat in HBM).
    gates = jnp.dot(x_ref[...].astype(mm_dtype), wih_ref[...],
                    preferred_element_type=jnp.float32)
    gates = gates + jnp.dot(h_ref[...].astype(mm_dtype), whh_ref[...],
                            preferred_element_type=jnp.float32)
    gates = gates + b_ref[...]                      # [1, 3*h_pad] broadcasts

    # h_pad is a multiple of 128 -> lane-tile-aligned free views (no XLU work).
    f = gates[:, 0 * h_pad:1 * h_pad]
    i = gates[:, 1 * h_pad:2 * h_pad]
    g = gates[:, 2 * h_pad:3 * h_pad]

    c1 = (jax.nn.sigmoid(f) * c0_ref[...].astype(jnp.float32)
          + jax.nn.sigmoid(i) * jnp.tanh(g))
    c1_ref[...] = c1.astype(c1_ref.dtype)


# --------------------------------------------------------------------------
# One-time parameter repacking (model-load time, not per call)
# --------------------------------------------------------------------------
def prepare_params(weight_ih, weight_hh, bias, hidden_dim,
                   matmul_dtype=jnp.bfloat16):
    """Lane-pad each gate's H columns to h_pad = round_up(H, 128).

    Returns (w_ih_p [D_in,3*h_pad], w_hh_p [H,3*h_pad], bias2d [1,3*h_pad], h_pad).
    Padded columns are exactly zero, so padded output lanes stay zero as long
    as c_0's padded lanes are zero.
    """
    input_dim, three_h = weight_ih.shape
    assert three_h == 3 * hidden_dim
    assert weight_hh.shape == (hidden_dim, three_h)
    h_pad = _round_up(hidden_dim, LANE)

    def pad_gate_cols(w):
        k = w.shape[0]
        w = w.reshape(k, 3, hidden_dim)
        w = jnp.pad(w, ((0, 0), (0, 0), (0, h_pad - hidden_dim)))
        return w.reshape(k, 3 * h_pad).astype(matmul_dtype)

    w_ih_p = pad_gate_cols(weight_ih)
    w_hh_p = pad_gate_cols(weight_hh)
    b = bias.reshape(3, hidden_dim).astype(jnp.float32)
    b = jnp.pad(b, ((0, 0), (0, h_pad - hidden_dim))).reshape(1, 3 * h_pad)
    return w_ih_p, w_hh_p, b, h_pad


# --------------------------------------------------------------------------
# Tiling / VMEM planning
# --------------------------------------------------------------------------
def _plan(batch, input_dim, hidden_dim, h_pad, matmul_dtype, act_dtype,
          out_dtype, vmem_budget_bytes, block_batch_cap):
    mm_b = jnp.dtype(matmul_dtype).itemsize
    act_b = jnp.dtype(act_dtype).itemsize
    out_b = jnp.dtype(out_dtype).itemsize

    # dtype-aware sublane alignment: 8 rows for f32, 16 for bf16, 32 for int8.
    row_align = max(SUBLANE, 32 // mm_b)
    bp = _round_up(batch, row_align)

    # Resident operands (conservatively counted double-buffered).
    resident = 2 * (input_dim + hidden_dim) * 3 * h_pad * mm_b   # W_ih + W_hh
    resident += 2 * 3 * h_pad * 4                                # bias

    # Streamed bytes per batch row: x/h0/c0 in + c1 out, double-buffered,
    # plus in-kernel f32 gates temp and bf16 cast temps.
    per_row = 2 * ((input_dim + hidden_dim) * act_b + h_pad * out_b + h_pad * out_b)
    per_row += 2 * 3 * h_pad * 4 + (input_dim + hidden_dim) * mm_b

    avail = max(vmem_budget_bytes - resident, per_row * row_align)
    tb = max(row_align, (avail // per_row) // row_align * row_align)
    tb = min(tb, block_batch_cap)
    # Guarantee grid >= 2 when the batch allows it so ("parallel",) actually
    # shards across both TensorCores on v7x (costless on v5e/v6e).
    if bp > row_align:
        tb = min(tb, _round_up(pl.cdiv(bp, 2), row_align))
    tb = min(tb, bp)
    bp = _round_up(bp, tb)        # remainder < tb, so wasted padding is small
    grid = (bp // tb,)

    vmem_limit = int(min(64 * 2 ** 20,
                         max(32 * 2 ** 20, 1.5 * (resident + per_row * tb))))
    return bp, tb, grid, vmem_limit


# --------------------------------------------------------------------------
# Padded-layout cell factory (preferred for time loops: pad once, reuse)
# --------------------------------------------------------------------------
def make_word_lstm_cell(batch, input_dim, hidden_dim, h_pad, *,
                        matmul_dtype=jnp.bfloat16, act_dtype=jnp.float32,
                        out_dtype=jnp.float32,
                        vmem_budget_bytes=32 * 2 ** 20, block_batch_cap=1024):
    """Returns (cell_fn, bp). cell_fn operates entirely in padded layout:

        c1_p [bp, h_pad] = cell_fn(x_p [bp, D_in], h0_p [bp, H],
                                   c0_p [bp, h_pad], w_ih_p, w_hh_p, bias2d)

    Callers driving a time loop should keep x/h/c in this layout and only
    pad/slice at sequence boundaries (avoids per-step HBM copies).
    """
    bp, tb, grid, vmem_limit = _plan(batch, input_dim, hidden_dim, h_pad,
                                     matmul_dtype, act_dtype, out_dtype,
                                     vmem_budget_bytes, block_batch_cap)

    call = pl.pallas_call(
        word_lstm_cell_kernel,
        out_shape=jax.ShapeDtypeStruct((bp, h_pad), out_dtype),
        grid=grid,
        in_specs=[
            pl.BlockSpec((tb, input_dim), lambda i: (i, 0)),         # x   (streamed)
            pl.BlockSpec((tb, hidden_dim), lambda i: (i, 0)),        # h0  (streamed)
            pl.BlockSpec((tb, h_pad), lambda i: (i, 0)),             # c0  (streamed)
            pl.BlockSpec((input_dim, 3 * h_pad), lambda i: (0, 0)),  # W_ih (resident)
            pl.BlockSpec((hidden_dim, 3 * h_pad), lambda i: (0, 0)), # W_hh (resident)
            pl.BlockSpec((1, 3 * h_pad), lambda i: (0, 0)),          # bias (resident)
        ],
        out_specs=pl.BlockSpec((tb, h_pad), lambda i: (i, 0)),
        compiler_params=pltpu.CompilerParams(
            dimension_semantics=("parallel",),
            vmem_limit_bytes=vmem_limit),
    )

    def cell(x_p, h0_p, c0_p, w_ih_p, w_hh_p, bias2d):
        assert x_p.shape == (bp, input_dim)
        assert h0_p.shape == (bp, hidden_dim)
        assert c0_p.shape == (bp, h_pad)
        return call(x_p, h0_p, c0_p, w_ih_p, w_hh_p, bias2d)

    return cell, bp


# --------------------------------------------------------------------------
# One-off convenience wrapper (pads + unpads around a single cell call)
# --------------------------------------------------------------------------
def word_lstm_cell(x, h0, c0, w_ih_p, w_hh_p, bias2d, h_pad, **kwargs):
    """c_1 = sigmoid(f) * c_0 + sigmoid(i) * tanh(g)   (WordLSTMCell.forward)."""
    batch, input_dim = x.shape
    hidden_dim = h0.shape[1]
    cell, bp = make_word_lstm_cell(batch, input_dim, hidden_dim, h_pad,
                                   matmul_dtype=w_ih_p.dtype,
                                   act_dtype=x.dtype, out_dtype=c0.dtype,
                                   **kwargs)
    pad_rows = bp - batch
    x_p = jnp.pad(x, ((0, pad_rows), (0, 0))) if pad_rows else x
    h0_p = jnp.pad(h0, ((0, pad_rows), (0, 0))) if pad_rows else h0
    c0_p = jnp.pad(c0, ((0, pad_rows), (0, h_pad - hidden_dim)))
    c1_p = cell(x_p, h0_p, c0_p, w_ih_p, w_hh_p, bias2d)
    return c1_p[:batch, :hidden_dim]


# --------------------------------------------------------------------------
# Parameter init mirroring WordLSTMCell.reset_parameters
# --------------------------------------------------------------------------
def init_params(key, input_dim, hidden_dim, dtype=jnp.float32):
    three_h = 3 * hidden_dim
    a = jax.random.normal(key, (max(input_dim, three_h), min(input_dim, three_h)),
                          dtype=jnp.float32)
    q, _ = jnp.linalg.qr(a)
    weight_ih = (q if input_dim >= three_h else q.T).astype(dtype)
    weight_ih = weight_ih.reshape(input_dim, three_h)
    # weight_hh = eye(hidden).repeat(1, 3)  -> [H, 3H]
    weight_hh = jnp.tile(jnp.eye(hidden_dim, dtype=dtype), (1, 3))
    bias = jnp.zeros((three_h,), dtype=dtype)
    return weight_ih, weight_hh, bias


# --------------------------------------------------------------------------
# References
# --------------------------------------------------------------------------
def reference(x, h0, c0, weight_ih, weight_hh, bias):
    """Direct transcription of the torch forward (f32).

    Note: the kernel's 'f32' path uses default MXU precision (reduced-precision
    passes); it matches to ~1e-4 here. Pass precision=HIGHEST if bit-faithful
    f32 gates are required.
    """
    hidden_dim = h0.shape[1]
    wh_b = bias[None, :] + h0 @ weight_hh
    wi = x @ weight_ih
    gates = wh_b + wi
    f = gates[:, :hidden_dim]
    i = gates[:, hidden_dim:2 * hidden_dim]
    g = gates[:, 2 * hidden_dim:]
    return jax.nn.sigmoid(f) * c0 + jax.nn.sigmoid(i) * jnp.tanh(g)


def reference_cast(x, h0, c0, weight_ih, weight_hh, bias, matmul_dtype):
    """Same math but with matmul operands cast (matches the bf16 MXU path)."""
    hidden_dim = h0.shape[1]
    gates = (jnp.dot(x.astype(matmul_dtype), weight_ih.astype(matmul_dtype),
                     preferred_element_type=jnp.float32)
             + jnp.dot(h0.astype(matmul_dtype), weight_hh.astype(matmul_dtype),
                       preferred_element_type=jnp.float32)
             + bias[None, :].astype(jnp.float32))
    f = gates[:, :hidden_dim]
    i = gates[:, hidden_dim:2 * hidden_dim]
    g = gates[:, 2 * hidden_dim:]
    return jax.nn.sigmoid(f) * c0 + jax.nn.sigmoid(i) * jnp.tanh(g)


# --------------------------------------------------------------------------
if __name__ == "__main__":
    # ---- config 1: tiny shapes, f32 matmul operands, strict check ----
    key = jax.random.PRNGKey(0)
    k_w, k_x, k_h, k_c = jax.random.split(key, 4)
    batch, input_dim, hidden_dim = 8, 16, 32

    weight_ih, weight_hh, bias = init_params(k_w, input_dim, hidden_dim)
    x = jax.random.normal(k_x, (batch, input_dim), dtype=jnp.float32)
    h0 = jax.random.normal(k_h, (batch, hidden_dim), dtype=jnp.float32)
    c0 = jax.random.normal(k_c, (batch, hidden_dim), dtype=jnp.float32)

    w_ih32, w_hh32, b32, h_pad = prepare_params(weight_ih, weight_hh, bias,
                                                hidden_dim,
                                                matmul_dtype=jnp.float32)
    c1 = word_lstm_cell(x, h0, c0, w_ih32, w_hh32, b32, h_pad)
    jax.block_until_ready(c1)
    c1_ref = reference(x, h0, c0, weight_ih, weight_hh, bias)
    assert c1.shape == (batch, hidden_dim)
    assert jnp.allclose(c1, c1_ref, atol=1e-4, rtol=1e-4), \
        float(jnp.max(jnp.abs(c1 - c1_ref)))

    # ---- config 2: bf16 MXU operands, padded-state flow, grid >= 2 ----
    k_w2, k_xa, k_xb, k_h2, k_c2 = jax.random.split(jax.random.PRNGKey(1), 5)
    batch2, input_dim2, hidden_dim2 = 64, 64, 96

    wih2, whh2, b2 = init_params(k_w2, input_dim2, hidden_dim2)
    xa = jax.random.normal(k_xa, (batch2, input_dim2), dtype=jnp.float32)
    xb = jax.random.normal(k_xb, (batch2, input_dim2), dtype=jnp.float32)
    h2 = jax.random.normal(k_h2, (batch2, hidden_dim2), dtype=jnp.float32)
    c2 = jax.random.normal(k_c2, (batch2, hidden_dim2), dtype=jnp.float32)

    wih_bf, whh_bf, b2d, h_pad2 = prepare_params(wih2, whh2, b2, hidden_dim2,
                                                 matmul_dtype=jnp.bfloat16)
    cell, bp = make_word_lstm_cell(batch2, input_dim2, hidden_dim2, h_pad2,
                                   matmul_dtype=jnp.bfloat16)
    # Pad once at the sequence boundary; keep c in padded layout across steps.
    pad_rows = bp - batch2
    xa_p = jnp.pad(xa, ((0, pad_rows), (0, 0))) if pad_rows else xa
    xb_p = jnp.pad(xb, ((0, pad_rows), (0, 0))) if pad_rows else xb
    h2_p = jnp.pad(h2, ((0, pad_rows), (0, 0))) if pad_rows else h2
    c_p = jnp.pad(c2, ((0, pad_rows), (0, h_pad2 - hidden_dim2)))

    c_p = cell(xa_p, h2_p, c_p, wih_bf, whh_bf, b2d)   # "timestep" 1
    c_p = cell(xb_p, h2_p, c_p, wih_bf, whh_bf, b2d)   # "timestep" 2 (state stays padded)
    c_out = jax.block_until_ready(c_p)[:batch2, :hidden_dim2]

    cr = reference_cast(xa, h2, c2, wih2, whh2, b2, jnp.bfloat16)
    cr = reference_cast(xb, h2, cr, wih2, whh2, b2, jnp.bfloat16)
    assert c_out.shape == (batch2, hidden_dim2)
    assert jnp.allclose(c_out, cr, atol=2e-2, rtol=2e-2), \
        float(jnp.max(jnp.abs(c_out - cr)))

    print("KERNEL_OK")
</pallas_src>

<mosaic_0001>
module attributes {stable_mosaic.version = 11 : i64} {
  func.func @word_lstm_cell_kernel(%arg0: i32, %arg1: memref<8x16xf32, #tpu.memory_space<vmem>>, %arg2: memref<8x32xf32, #tpu.memory_space<vmem>>, %arg3: memref<8x128xf32, #tpu.memory_space<vmem>>, %arg4: memref<16x384xf32, #tpu.memory_space<vmem>>, %arg5: memref<32x384xf32, #tpu.memory_space<vmem>>, %arg6: memref<1x384xf32, #tpu.memory_space<vmem>>, %arg7: memref<8x128xf32, #tpu.memory_space<vmem>>) attributes {dimension_semantics = [#tpu.dimension_semantics<parallel>], iteration_bounds = array<i64: 1>, scalar_prefetch = 0 : i64, scratch_operands = 0 : i64, tpu.core_type = #tpu.core_type<tc>, window_params = [{transform_indices = @transform_0, window_bounds = array<i64: 8, 16>}, {transform_indices = @transform_1, window_bounds = array<i64: 8, 32>}, {transform_indices = @transform_2, window_bounds = array<i64: 8, 128>}, {pipeline_mode = #tpu.pipeline_mode<synchronous>, transform_indices = @transform_3, window_bounds = array<i64: 16, 384>}, {pipeline_mode = #tpu.pipeline_mode<synchronous>, transform_indices = @transform_4, window_bounds = array<i64: 32, 384>}, {pipeline_mode = #tpu.pipeline_mode<synchronous>, transform_indices = @transform_5, window_bounds = array<i64: 1, 384>}, {transform_indices = @transform_6, window_bounds = array<i64: 8, 128>}]} {
    %c0 = arith.constant 0 : index
    %c0_0 = arith.constant 0 : index
    %0 = vector.load %arg1[%c0, %c0_0] : memref<8x16xf32, #tpu.memory_space<vmem>>, vector<8x16xf32>
    %c0_1 = arith.constant 0 : index
    %c0_2 = arith.constant 0 : index
    %1 = vector.load %arg4[%c0_1, %c0_2] : memref<16x384xf32, #tpu.memory_space<vmem>>, vector<16x384xf32>
    %cst = arith.constant dense<0.000000e+00> : vector<8x384xf32>
    %2 = tpu.matmul %0, %1, %cst {dimension_numbers = #tpu.dot_dimension_numbers<[1], [0], [0], [1], [0, 0, 1, 1], [], []>} : vector<8x16xf32>, vector<16x384xf32>, vector<8x384xf32> -> vector<8x384xf32>
    %c0_3 = arith.constant 0 : index
    %c0_4 = arith.constant 0 : index
    %3 = vector.load %arg2[%c0_3, %c0_4] : memref<8x32xf32, #tpu.memory_space<vmem>>, vector<8x32xf32>
    %c0_5 = arith.constant 0 : index
    %c0_6 = arith.constant 0 : index
    %4 = vector.load %arg5[%c0_5, %c0_6] : memref<32x384xf32, #tpu.memory_space<vmem>>, vector<32x384xf32>
    %cst_7 = arith.constant dense<0.000000e+00> : vector<8x384xf32>
    %5 = tpu.matmul %3, %4, %cst_7 {dimension_numbers = #tpu.dot_dimension_numbers<[1], [0], [0], [1], [0, 0, 1, 1], [], []>} : vector<8x32xf32>, vector<32x384xf32>, vector<8x384xf32> -> vector<8x384xf32>
    %6 = arith.addf %2, %5 : vector<8x384xf32>
    %c0_8 = arith.constant 0 : index
    %c0_9 = arith.constant 0 : index
    %7 = vector.load %arg6[%c0_8, %c0_9] : memref<1x384xf32, #tpu.memory_space<vmem>>, vector<1x384xf32>
    %8 = vector.broadcast %7 : vector<1x384xf32> to vector<8x384xf32>
    %9 = arith.addf %6, %8 : vector<8x384xf32>
    %10 = vector.extract_strided_slice %9 {offsets = [0, 0], sizes = [8, 128], strides = [1, 1]} : vector<8x384xf32> to vector<8x128xf32>
    %11 = vector.extract_strided_slice %9 {offsets = [0, 128], sizes = [8, 128], strides = [1, 1]} : vector<8x384xf32> to vector<8x128xf32>
    %12 = vector.extract_strided_slice %9 {offsets = [0, 256], sizes = [8, 128], strides = [1, 1]} : vector<8x384xf32> to vector<8x128xf32>
    %13 = arith.negf %10 : vector<8x128xf32>
    %14 = math.exp %13 : vector<8x128xf32>
    %cst_10 = arith.constant 1.000000e+00 : f32
    %15 = vector.broadcast %cst_10 : f32 to vector<8x128xf32>
    %16 = arith.addf %15, %14 : vector<8x128xf32>
    %17 = arith.divf %15, %16 : vector<8x128xf32>
    %c0_11 = arith.constant 0 : index
    %c0_12 = arith.constant 0 : index
    %18 = vector.load %arg3[%c0_11, %c0_12] : memref<8x128xf32, #tpu.memory_space<vmem>>, vector<8x128xf32>
    %19 = arith.mulf %17, %18 : vector<8x128xf32>
    %20 = arith.negf %11 : vector<8x128xf32>
    %21 = math.exp %20 : vector<8x128xf32>
    %cst_13 = arith.constant 1.000000e+00 : f32
    %22 = vector.broadcast %cst_13 : f32 to vector<8x128xf32>
    %23 = arith.addf %22, %21 : vector<8x128xf32>
    %24 = arith.divf %22, %23 : vector<8x128xf32>
    %25 = math.tanh %12 : vector<8x128xf32>
    %26 = arith.mulf %24, %25 : vector<8x128xf32>
    %27 = arith.addf %19, %26 : vector<8x128xf32>
    %c0_14 = arith.constant 0 : index
    %c0_15 = arith.constant 0 : index
    %28 = vector.load %arg7[%c0_14, %c0_15] : memref<8x128xf32, #tpu.memory_space<vmem>>, vector<8x128xf32>
    tpu.vector_store %arg7[%c0_14, %c0_15], %27 {strides = array<i32>} : memref<8x128xf32, #tpu.memory_space<vmem>>, vector<8x128xf32>,
    return
  }
  func.func @transform_0(%arg0: i32) -> (i32, i32) {
    %c0_i32 = arith.constant 0 : i32
    %c0_i32_0 = arith.constant 0 : i32
    return %arg0, %c0_i32 : i32, i32
  }
  func.func @transform_1(%arg0: i32) -> (i32, i32) {
    %c0_i32 = arith.constant 0 : i32
    %c0_i32_0 = arith.constant 0 : i32
    return %arg0, %c0_i32 : i32, i32
  }
  func.func @transform_2(%arg0: i32) -> (i32, i32) {
    %c0_i32 = arith.constant 0 : i32
    %c0_i32_0 = arith.constant 0 : i32
    return %arg0, %c0_i32 : i32, i32
  }
  func.func @transform_3(%arg0: i32) -> (i32, i32) {
    %c0_i32 = arith.constant 0 : i32
    %c0_i32_0 = arith.constant 0 : i32
    %c0_i32_1 = arith.constant 0 : i32
    return %c0_i32, %c0_i32_0 : i32, i32
  }
  func.func @transform_4(%arg0: i32) -> (i32, i32) {
    %c0_i32 = arith.constant 0 : i32
    %c0_i32_0 = arith.constant 0 : i32
    %c0_i32_1 = arith.constant 0 : i32
    return %c0_i32, %c0_i32_0 : i32, i32
  }
  func.func @transform_5(%arg0: i32) -> (i32, i32) {
    %c0_i32 = arith.constant 0 : i32
    %c0_i32_0 = arith.constant 0 : i32
    %c0_i32_1 = arith.constant 0 : i32
    return %c0_i32, %c0_i32_0 : i32, i32
  }
  func.func @transform_6(%arg0: i32) -> (i32, i32) {
    %c0_i32 = arith.constant 0 : i32
    %c0_i32_0 = arith.constant 0 : i32
    return %arg0, %c0_i32 : i32, i32
  }
}

</mosaic_0001>

<bundles_post_ra>
// kernel: tpu_custom_call.1
= control target key start
LH: loop header
LB: loop body
LE: loop exit
PB: predicated region body
PF: predicated region fallthrough
CT: control target
= control target key end

     0   :  { %11 = vsyncpa [#allocation3], 0  ;;  %s566_s0 = inlined_call_operand.hbm [shape: f32[8,16], index: 0, kind: input, shape index: {}]   ;;  %s567_s1 = inlined_call_operand.hbm [shape: f32[8,32], index: 1, kind: input, shape index: {}]   ;;  %s568_s2 = inlined_call_operand.hbm [shape: f32[8,128], index: 2, kind: input, shape index: {}]   ;;  %s569_s3 = inlined_call_operand.hbm [shape: f32[16,384], index: 3, kind: input, shape index: {}]   ;;  %s570_s4 = inlined_call_operand.hbm [shape: f32[32,384], index: 4, kind: input, shape index: {}]   ;;  %s571_s5 = inlined_call_operand.vmem [shape: f32[1,384], index: 5, kind: input, shape index: {}]   ;;  %s572_s6 = inlined_call_operand.hbm [shape: f32[8,128], index: 6, kind: output, shape index: {}]  }
   0x1   :  { %12 = vsyncpa [#allocation6], 0 }
   0x2   :  { %13 = vsyncpa [#allocation9], 0  ;;  %s31_s23 = sshll.u32 %s567_s1, 4  ;;  %s32_s23 = int_to_ptr.hbm [resolvable:$true] %s31_s23 }
   0x3   :  { %14 = vsyncpa [#allocation4], 0  ;;  %s496_s24 = smov [#allocation5]   ;;  %s52_s28 = sshll.u32 %s569_s3, 4  ;;  %s53_s28 = int_to_ptr.hbm [resolvable:$true] %s52_s28 }
   0x4   :  { %s33_s25 = sshll.u32 %s496_s24, 4  ;;  %s497_s29 = smov [#allocation8]   ;;  %s34_s25 = int_to_ptr.vmem [resolvable:$true] %s33_s25 }
   0x5   :  { %36 = dma.hbm_to_vmem [thread:$0]  %s32_s23, 128, %s34_s25, [#allocation6]  }
   0x6   :  { %s54_s30 = sshll.u32 %s497_s29, 4  ;;  %s498_s7 = smov 384   ;;  %s55_s30 = int_to_ptr.vmem [resolvable:$true] %s54_s30 }
   0x7   :  { %s499_s8 = smov 24   ;;  %s20_s1 = sshll.u32 %s566_s0, 4  ;;  %s21_s1 = int_to_ptr.hbm [resolvable:$true] %s20_s1 }
   0x8   :  { %60 = dma.hbm_to_vmem [thread:$0]  %s53_s28, 768, %s55_s30, [#allocation9], %s498_s7, %s498_s7, %s499_s8  }
   0x9   :  { %s500_s11 = smov [#allocation2]   ;;  %s42_s3 = sshll.u32 %s568_s2, 4  ;;  %s43_s3 = int_to_ptr.hbm [resolvable:$true] %s42_s3 }
   0xa   :  { %s22_s12 = sshll.u32 %s500_s11, 4  ;;  %s501_s15 = smov [#allocation7]   ;;  %s23_s12 = int_to_ptr.vmem [resolvable:$true] %s22_s12 }
   0xb   :  { %25 = dma.hbm_to_vmem [thread:$0]  %s21_s1, 128, %s23_s12, [#allocation3]  }
   0xc   :  { %s44_s16 = sshll.u32 %s501_s15, 4  ;;  %s65_s19 = sshll.u32 %s570_s4, 4  ;;  %s45_s16 = int_to_ptr.vmem [resolvable:$true] %s44_s16  ;;  %s66_s19 = int_to_ptr.hbm [resolvable:$true] %s65_s19 }
   0xd   :  { %47 = dma.hbm_to_vmem [thread:$0]  %s43_s3, 128, %s45_s16, [#allocation6]  }
   0xe   :  { %s502_s0 = smov [#allocation10]  }
   0xf   :  { %s67_s20 = sshll.u32 %s502_s0, 4  ;;  %s68_s20 = int_to_ptr.vmem [resolvable:$true] %s67_s20 }
  0x10   :  { %73 = dma.hbm_to_vmem [thread:$0]  %s66_s19, 1536, %s68_s20, [#allocation9], %s498_s7, %s498_s7, %s499_s8  }
  0x11   :  { %488 = dma.done.wait [#allocation3], 128  }
  0x12   :  { %489 = vsyncadd [#allocation3], 4294967168 }
  0x13   :  { %490 = dma.done.wait [#allocation6], 256  }
  0x14   :  { %491 = vsyncadd [#allocation6], 4294967040 }
  0x15   :  { %492 = dma.done.wait [#allocation9], 2304  }
  0x16   :  { %493 = vsyncadd [#allocation9], 4294964992  ;;  %v100_v0 = vld [vmem:[#allocation8 + $0x18] sm:$0xff]  ;;  %v97_v2 = vld [vmem:[#allocation8] sm:$0xff]  ;;  %vm180_vm0 = vcmask 130048   ;;  %vm116_vm1 = vcmask 261120  }
  0x17   :  { %v113_v1 = vld [vmem:[#allocation10 + $0x48] sm:$0xff]  ;;  %198 = vmatpush.msra.mxu3 %v100_v0  ;;  %v96_v3 = vld [vmem:[#allocation2] sm:$0xff]  ;;  %v110_v4 = vld [vmem:[#allocation10 + $0x30] sm:$0xff]  ;;  %s306_s24 = sshll.u32 %s572_s6, 4  ;;  %s307_s24 = int_to_ptr.hbm [resolvable:$true] %s306_s24 }
  0x18   :  { %132 = vmatpush.msra.mxu0 %v113_v1  ;;  %v101_v5 = vld [vmem:[#allocation8 + $0x20] sm:$0xff]  ;;  %v107_v6 = vld [vmem:[#allocation10 + $0x18] sm:$0xff]  ;;  %v104_v10 = vld [vmem:[#allocation10] sm:$0xff] }
  0x19   :  { %199 = vmatpush.msra.mxu3 %v97_v2  ;;  %v114_v7 = vld [vmem:[#allocation10 + $0x50] sm:$0xff]  ;;  %v111_v8 = vld [vmem:[#allocation10 + $0x38] sm:$0xff]  ;;  %v103_v12 = vld [vmem:[#allocation5] sm:$0xff] }
  0x1a   :  { %133 = vmatpush.msra.mxu0 %v110_v4  ;;  %321 = vmatmul.msk.f32.vlgmr.msra.gmra.mxu3 %vm180_vm0, %v96_v3  ;;  %v98_v9 = vld [vmem:[#allocation8 + $0x8] sm:$0xff]  ;;  %v108_v13 = vld [vmem:[#allocation10 + $0x20] sm:$0xff]  ;;  %v105_v16 = vld [vmem:[#allocation10 + $0x8] sm:$0xff] }
  0x1b   :  { %152 = vmatpush.msra.mxu1 %v114_v7  ;;  %v115_v11 = vld [vmem:[#allocation10 + $0x58] sm:$0xff]  ;;  %218 = vmatpush.msrb.mxu3 %v101_v5  ;;  %v112_v14 = vld [vmem:[#allocation10 + $0x40] sm:$0xff]  ;;  %v109_v17 = vld [vmem:[#allocation10 + $0x28] sm:$0xff] }
  0x1c   :  { %134 = vmatpush.msra.mxu0 %v107_v6  ;;  %172 = vmatpush.msra.mxu2 %v115_v11  ;;  %v102_v15 = vld [vmem:[#allocation8 + $0x28] sm:$0xff]  ;;  %v99_v18 = vld [vmem:[#allocation8 + $0x10] sm:$0xff]  ;;  %v106_v19 = vld [vmem:[#allocation10 + $0x10] sm:$0xff] }
  0x1d   :  { %153 = vmatpush.msra.mxu1 %v111_v8  ;;  %219 = vmatpush.msrb.mxu3 %v98_v9  ;;  %v244_v20 = vld [vmem:[%s571_s5] sm:$0x7]  ;;  %v274_v60 = vld [vmem:[#allocation7] sm:$0xff]  ;;  %s503_s5 = smov [#allocation11]  }
  0x1e   :  { %135 = vmatpush.msra.mxu0 %v104_v10  ;;  %173 = vmatpush.msra.mxu2 %v112_v14  ;;  %v246_v22 = vperm.slane %v244_v20, 0  ;;  %v247_v28 = vperm.slane %v244_v20, 1  ;;  %v248_v42 = vperm.slane %v244_v20, 2  ;;  %s304_s21 = sshll.u32 %s503_s5, 4  ;;  %s305_s21 = int_to_ptr.vmem [resolvable:$true] %s304_s21 }
  0x1f   :  { %318 = vmatmul.msk.f32.vlgmr.msra.gmra.mxu0 %vm116_vm1, %v103_v12  ;;  %154 = vmatpush.msra.mxu1 %v108_v13 }
  0x20   :  { %238 = vmatpush.msrb.mxu0 %v102_v15  ;;  %174 = vmatpush.msra.mxu2 %v109_v17 }
  0x21   :  { %155 = vmatpush.msra.mxu1 %v105_v16 }
  0x22   :  { %319 = vmatmul.msk.f32.vlgmr.msra.gmra.mxu1 %vm116_vm1, %v103_v12  ;;  %322 = vmatmul.msk.f32.vlgmr.msrb.gmra.mxu3 %vm180_vm0, %v96_v3 }
  0x23   :  { %239 = vmatpush.msrb.mxu0 %v99_v18  ;;  %175 = vmatpush.msra.mxu2 %v106_v19 }
  0x24   :  { %320 = vmatmul.msk.f32.vlgmr.msra.gmra.mxu2 %vm116_vm1, %v103_v12 }
  0x27   :  { %323 = vmatmul.msk.f32.vlgmr.msrb.gmra.mxu0 %vm180_vm0, %v96_v3 }
  0x9c   :  { %v137_v21 = vpop.f32.mrf.mxu0 }
  0x9d   :  { %v201_v23 = vpop.f32.mrf.mxu3 }
  0x9e   :  { %v202_v24 = vadd.f32 %v201_v23, %v137_v21 }
  0x9f   :  { %v157_v27 = vpop.f32.mrf.mxu1 }
  0xa0   :  { %v252_v25 = vadd.f32 %v246_v22, %v202_v24 }
  0xa2   :  { %v324_v26 = vmul.f32 -1.442695, %v252_v25 }
  0xa4   :  { %334 = vpow2.f32 %v324_v26  ;;  %v241_v37 = vpop.f32.mrf.mxu0 }
  0xa5   :  { %v221_v29 = vpop.f32.mrf.mxu3 }
  0xa6   :  { %v222_v30 = vadd.f32 %v221_v29, %v157_v27 }
  0xa7   :  { %v177_v36 = vpop.f32.mrf.mxu2 }
  0xa8   :  { %v253_v31 = vadd.f32 %v247_v28, %v222_v30  ;;  %v242_v41 = vadd.f32 %v241_v37, %v177_v36 }
  0xaa   :  { %v335_v32 = vpop.eup %334  ;;  %v325_v33 = vmul.f32 -1.442695, %v253_v31  ;;  %v254_v45 = vadd.f32 %v248_v42, %v242_v41 }
  0xab   :  { %v258_v34 = vadd.f32 1.0, %v335_v32 }
  0xac   :  { %336 = vpow2.f32 %v325_v33 }
  0xad   :  { %338 = vrcp.f32 %v258_v34  ;;  %v270_v49 = vand.u32 2147483648, %v258_v34  ;;  %vm264_vm3 = vweird.f32 %v258_v34  ;;  %v268_v51 = vand.u32 2147483647, %v258_v34 }
  0xaf   :  { %v271_v56 = vor.u32 1.1754944e-38, %v270_v49  ;;  %vm269_vm6 = vcmp.eq.f32.partialorder %v268_v51, 8.507059e+37 }
  0xb2   :  { %v337_v35 = vpop.eup %336 }
  0xb3   :  { %v339_v38 = vpop.eup %338  ;;  %v279_v39 = vadd.f32 1.0, %v337_v35 }
  0xb4   :  { %v260_v40 = vmul.f32 %v339_v38, %v258_v34  ;;  %vm265_vm2 = vweird.f32 %v339_v38 }
  0xb5   :  { %340 = vrcp.f32 %v279_v39  ;;  %vm266_vm4 = vmor %vm264_vm3, %vm265_vm2  ;;  %v291_v52 = vand.u32 2147483648, %v279_v39  ;;  %v289_v55 = vand.u32 2147483647, %v279_v39  ;;  %vm285_vm7 = vweird.f32 %v279_v39 }
  0xb6   :  { %v261_v43 = vsub.f32 1.0, %v260_v40  ;;  %342 = vtanh.f32 %v254_v45 }
  0xb7   :  { %v292_v61 = vor.u32 1.1754944e-38, %v291_v52  ;;  %vm290_vm9 = vcmp.eq.f32.partialorder %v289_v55, 8.507059e+37 }
  0xb8   :  { %v262_v44 = vmul.f32 %v339_v38, %v261_v43 }
  0xba   :  { %v263_v48 = vadd.f32 %v339_v38, %v262_v44 }
  0xbb   :  { %v341_v46 = vpop.eup %340 }
  0xbc   :  { %v281_v47 = vmul.f32 %v341_v46, %v279_v39  ;;  %v267_v53 = vsel %vm266_vm4, %v339_v38, %v263_v48  ;;  %vm286_vm5 = vweird.f32 %v341_v46  ;;  %v343_v58 = vpop.eup %342 }
  0xbd   :  { %v272_v59 = vsel %vm269_vm6, %v271_v56, %v267_v53  ;;  %vm287_vm8 = vmor %vm285_vm7, %vm286_vm5 }
  0xbe   :  { %v282_v50 = vsub.f32 1.0, %v281_v47  ;;  %v275_v0 = vmul.f32 %v274_v60, %v272_v59 }
  0xc0   :  { %v283_v54 = vmul.f32 %v341_v46, %v282_v50 }
  0xc2   :  { %v284_v57 = vadd.f32 %v341_v46, %v283_v54 }
  0xc4   :  { %v288_v62 = vsel %vm287_vm8, %v341_v46, %v284_v57 }
  0xc5   :  { %v293_v63 = vsel %vm290_vm9, %v292_v61, %v288_v62 }
  0xc6   :  { %v296_v1 = vmul.f32 %v343_v58, %v293_v63 }
  0xc8   :  { %v297_v2 = vadd.f32 %v296_v1, %v275_v0 }
  0xca   :  { %298 = vst [vmem:[#allocation11] sm:$0xff] %v297_v2 }
  0xcb   :  { %309 = dma.vmem_to_hbm [thread:$0]  %s305_s21, 128, %s307_s24, [#allocation4]  }
  0xcc   :  { %494 = dma.done.wait [#allocation4], 128  }
  0xcd   :  { %495 = vsyncadd [#allocation4], 4294967168 }
  0xce   :  { %314 = vsyncpa [#allocation3], 1 }
  0xcf   :  { %315 = vsyncpa [#allocation6], 1 }
  0xd0   :  { %316 = vsyncpa [#allocation9], 1 }
  0xd1   :  { %317 = vsyncpa [#allocation4], 1 }

</bundles_post_ra>
